<compile_context>
chip_gen: v7x
topology: tpu7x:2x2x1
jax: 0.10.0
libtpu: 0.0.40
codegen_flags: <defaults>
</compile_context>

<pallas_src>
import jax
import jax.numpy as jnp
from jax import lax
from jax.experimental import pallas as pl
from jax.experimental.pallas import tpu as pltpu


def lstm_tagger_kernel(sent_ref, emb_ref, w_ih_ref, w_hh_ref, b_ref,
                       w_out_ref, b_out_ref, out_ref, hs_ref):
    T = sent_ref.shape[0]
    V = emb_ref.shape[0]
    H, four_h = w_hh_ref.shape            # (H, 4H), unpadded

    # ---- 0) Hoist only the params the recurrence needs (w_out/b_out are
    #         deliberately NOT read here: they would pin vregs across the
    #         fully-unrolled loop). -----------------------------------------
    emb = emb_ref[...]                    # (V, E)
    w_ih = w_ih_ref[...]                  # (E, 4H)
    w_hh = w_hh_ref[...]                  # (H, 4H)
    b = b_ref[...]                        # (1, 4H)   combined b_ih + b_hh

    # ---- 1) Embedding lookup as one-hot matmul (vectorized gather) ---------
    sent = sent_ref[...]                                     # (T, 1) int32
    iota_v = lax.broadcasted_iota(jnp.int32, (T, V), 1)      # (T, V)
    onehot = (iota_v == sent).astype(jnp.float32)            # (T, V)
    embeds = jnp.dot(onehot, emb,
                     preferred_element_type=jnp.float32)     # (T, E)

    # ---- 2) Input projections for every timestep; (T,4H)=(8,128) = 1 vreg --
    xproj = jnp.dot(embeds, w_ih,
                    preferred_element_type=jnp.float32) + b  # (T, 4H)

    # Constant lane-scale: 2 on the g block so one sigmoid pass also yields
    # tanh via tanh(x) = 2*sigmoid(2x) - 1.  Built ONCE, outside the loop.
    lane = lax.broadcasted_iota(jnp.int32, (1, four_h), 1)
    gate_scale = jnp.where((lane >= 2 * H) & (lane < 3 * H),
                           2.0, 1.0).astype(jnp.float32)     # (1, 4H)

    # ---- 3) Fully unrolled LSTM recurrence (PyTorch gate order i, f, g, o) -
    # c is kept full-width (1, 4H): lanes >= H hold bounded finite garbage
    # that never feeds a matmul or the output (only h_lo = h[:, :H] does).
    h_lo = jnp.zeros((1, H), jnp.float32)
    c = jnp.zeros((1, four_h), jnp.float32)
    for t in range(T):
        z = xproj[t:t + 1, :] + jnp.dot(
            h_lo, w_hh, preferred_element_type=jnp.float32)  # (1, 4H)
        s = jax.nn.sigmoid(z * gate_scale)  # [sig(i)|sig(f)|sig(2g)|sig(o)]
        # Lane-align the gates onto lanes [0, H) with XLU rolls.
        f_al = pltpu.roll(s, 3 * H, axis=1)          # sig(f)   -> lanes [0,H)
        g_al = 2.0 * pltpu.roll(s, 2 * H, axis=1) - 1.0  # tanh(g) -> [0,H)
        o_al = pltpu.roll(s, H, axis=1)              # sig(o)   -> lanes [0,H)
        c = f_al * c + s * g_al                      # lanes [0,H): f*c + i*g
        h_full = o_al * jnp.tanh(c)                  # (1, 4H)
        h_lo = h_full[:, :H]                         # (1, H)  live lanes only
        hs_ref[t:t + 1, :] = h_lo                    # off-chain vst

    # ---- 4) hidden2tag + log_softmax (params read only now) ----------------
    w_out = w_out_ref[...]                # (H, TAG)
    b_out = b_out_ref[...]                # (1, TAG)
    hs = hs_ref[...]                      # (T, H)
    tag_space = jnp.dot(hs, w_out,
                        preferred_element_type=jnp.float32) + b_out  # (T,TAG)
    m = jnp.max(tag_space, axis=-1, keepdims=True)
    sft = tag_space - m
    lse = jnp.log(jnp.sum(jnp.exp(sft), axis=-1, keepdims=True))
    out_ref[...] = sft - lse


def prepare_lstm_tagger_params(emb, w_ih, w_hh, b_ih, b_hh, w_out, b_out):
    """One-time parameter preprocessing (do NOT call per inference)."""
    four_h = w_ih.shape[0]
    return (
        jnp.asarray(emb, jnp.float32),                       # (V, E)
        jnp.asarray(w_ih, jnp.float32).T,                    # (E, 4H)
        jnp.asarray(w_hh, jnp.float32).T,                    # (H, 4H)
        (jnp.asarray(b_ih, jnp.float32)
         + jnp.asarray(b_hh, jnp.float32)).reshape(1, four_h),  # (1, 4H)
        jnp.asarray(w_out, jnp.float32).T,                   # (H, TAG)
        jnp.asarray(b_out, jnp.float32).reshape(1, -1),      # (1, TAG)
    )


@jax.jit
def lstm_tagger_pallas(sentence, params):
    """sentence: (T,) int32; params: output of prepare_lstm_tagger_params.
    Returns (T, TAG) f32 log-probabilities."""
    emb, w_ih_t, w_hh_t, b, w_out_t, b_out2d = params
    T = sentence.shape[0]
    H = w_hh_t.shape[0]
    tagset = w_out_t.shape[1]

    sent2d = sentence.astype(jnp.int32).reshape(T, 1)
    vmem = pl.BlockSpec(memory_space=pltpu.MemorySpace.VMEM)
    return pl.pallas_call(
        lstm_tagger_kernel,
        out_shape=jax.ShapeDtypeStruct((T, tagset), jnp.float32),
        in_specs=[vmem] * 7,
        out_specs=vmem,
        scratch_shapes=[pltpu.VMEM((T, H), jnp.float32)],
    )(sent2d, emb, w_ih_t, w_hh_t, b, w_out_t, b_out2d)


def lstm_tagger_ref(sentence, emb, w_ih, w_hh, b_ih, b_hh, w_out, b_out):
    """Pure-JAX reference mirroring the PyTorch forward pass."""
    H = w_hh.shape[1]
    embeds = emb[sentence]                                    # (T, E)
    xproj = embeds @ w_ih.T + b_ih + b_hh                     # (T, 4H)

    def step(carry, xp):
        h, c = carry
        z = xp + h @ w_hh.T
        i = jax.nn.sigmoid(z[0:H])
        f = jax.nn.sigmoid(z[H:2 * H])
        g = jnp.tanh(z[2 * H:3 * H])
        o = jax.nn.sigmoid(z[3 * H:4 * H])
        c_new = f * c + i * g
        h_new = o * jnp.tanh(c_new)
        return (h_new, c_new), h_new

    h0 = jnp.zeros((H,), jnp.float32)
    c0 = jnp.zeros((H,), jnp.float32)
    _, hs = lax.scan(step, (h0, c0), xproj)                   # (T, H)
    tag_space = hs @ w_out.T + b_out
    return jax.nn.log_softmax(tag_space, axis=1)


if __name__ == "__main__":
    # Small, deterministic configuration.
    EMBEDDING_DIM = 16
    HIDDEN_DIM = 32
    VOCAB_SIZE = 16
    TAGSET_SIZE = 8
    SEQ_LEN = 8

    key = jax.random.PRNGKey(0)
    ks = jax.random.split(key, 8)
    k_lstm = 1.0 / jnp.sqrt(HIDDEN_DIM)

    emb = jax.random.normal(ks[0], (VOCAB_SIZE, EMBEDDING_DIM), jnp.float32)
    w_ih = jax.random.uniform(ks[1], (4 * HIDDEN_DIM, EMBEDDING_DIM),
                              jnp.float32, -k_lstm, k_lstm)
    w_hh = jax.random.uniform(ks[2], (4 * HIDDEN_DIM, HIDDEN_DIM),
                              jnp.float32, -k_lstm, k_lstm)
    b_ih = jax.random.uniform(ks[3], (4 * HIDDEN_DIM,), jnp.float32,
                              -k_lstm, k_lstm)
    b_hh = jax.random.uniform(ks[4], (4 * HIDDEN_DIM,), jnp.float32,
                              -k_lstm, k_lstm)
    w_out = jax.random.uniform(ks[5], (TAGSET_SIZE, HIDDEN_DIM), jnp.float32,
                               -k_lstm, k_lstm)
    b_out = jax.random.uniform(ks[6], (TAGSET_SIZE,), jnp.float32,
                               -k_lstm, k_lstm)
    sentence = jax.random.randint(ks[7], (SEQ_LEN,), 0, VOCAB_SIZE, jnp.int32)

    # One-time weight preprocessing (out of the per-call path).
    params = prepare_lstm_tagger_params(emb, w_ih, w_hh, b_ih, b_hh,
                                        w_out, b_out)

    out = lstm_tagger_pallas(sentence, params)
    out = jax.block_until_ready(out)

    ref = lstm_tagger_ref(sentence, emb, w_ih, w_hh, b_ih, b_hh, w_out, b_out)
    ref = jax.block_until_ready(ref)

    assert out.shape == (SEQ_LEN, TAGSET_SIZE)
    assert jnp.allclose(out, ref, atol=1e-4, rtol=1e-4), (
        f"max abs err {jnp.max(jnp.abs(out - ref))}")
    print("KERNEL_OK")
</pallas_src>

<mosaic_0001>
module attributes {stable_mosaic.version = 11 : i64} {
  func.func @lstm_tagger_kernel(%arg0: memref<8x1xi32, #tpu.memory_space<vmem>>, %arg1: memref<16x16xf32, #tpu.memory_space<vmem>>, %arg2: memref<16x128xf32, #tpu.memory_space<vmem>>, %arg3: memref<32x128xf32, #tpu.memory_space<vmem>>, %arg4: memref<1x128xf32, #tpu.memory_space<vmem>>, %arg5: memref<32x8xf32, #tpu.memory_space<vmem>>, %arg6: memref<1x8xf32, #tpu.memory_space<vmem>>, %arg7: memref<8x8xf32, #tpu.memory_space<vmem>>, %arg8: memref<8x32xf32, #tpu.memory_space<vmem>>) attributes {dimension_semantics = [], scalar_prefetch = 0 : i64, scratch_operands = 1 : i64, tpu.core_type = #tpu.core_type<tc>} {
    %c0 = arith.constant 0 : index
    %c0_0 = arith.constant 0 : index
    %0 = vector.load %arg1[%c0, %c0_0] : memref<16x16xf32, #tpu.memory_space<vmem>>, vector<16x16xf32>
    %c0_1 = arith.constant 0 : index
    %c0_2 = arith.constant 0 : index
    %1 = vector.load %arg2[%c0_1, %c0_2] : memref<16x128xf32, #tpu.memory_space<vmem>>, vector<16x128xf32>
    %c0_3 = arith.constant 0 : index
    %c0_4 = arith.constant 0 : index
    %2 = vector.load %arg3[%c0_3, %c0_4] : memref<32x128xf32, #tpu.memory_space<vmem>>, vector<32x128xf32>
    %c0_5 = arith.constant 0 : index
    %c0_6 = arith.constant 0 : index
    %3 = vector.load %arg4[%c0_5, %c0_6] : memref<1x128xf32, #tpu.memory_space<vmem>>, vector<1x128xf32>
    %c0_7 = arith.constant 0 : index
    %c0_8 = arith.constant 0 : index
    %4 = vector.load %arg0[%c0_7, %c0_8] : memref<8x1xi32, #tpu.memory_space<vmem>>, vector<8x1xi32>
    %5 = tpu.iota {dimensions = array<i32: 1>} : vector<8x16xi32>
    %6 = vector.broadcast %4 : vector<8x1xi32> to vector<8x16xi32>
    %7 = arith.cmpi eq, %5, %6 : vector<8x16xi32>
    %8 = arith.extui %7 : vector<8x16xi1> to vector<8x16xi32>
    %9 = arith.sitofp %8 : vector<8x16xi32> to vector<8x16xf32>
    %cst = arith.constant dense<0.000000e+00> : vector<8x16xf32>
    %10 = tpu.matmul %9, %0, %cst {dimension_numbers = #tpu.dot_dimension_numbers<[1], [0], [0], [1], [0, 0, 1, 1], [], []>} : vector<8x16xf32>, vector<16x16xf32>, vector<8x16xf32> -> vector<8x16xf32>
    %cst_9 = arith.constant dense<0.000000e+00> : vector<8x128xf32>
    %11 = tpu.matmul %10, %1, %cst_9 {dimension_numbers = #tpu.dot_dimension_numbers<[1], [0], [0], [1], [0, 0, 1, 1], [], []>} : vector<8x16xf32>, vector<16x128xf32>, vector<8x128xf32> -> vector<8x128xf32>
    %12 = vector.broadcast %3 : vector<1x128xf32> to vector<8x128xf32>
    %13 = arith.addf %11, %12 : vector<8x128xf32>
    %14 = tpu.iota {dimensions = array<i32: 1>} : vector<1x128xi32>
    %c64_i32 = arith.constant 64 : i32
    %15 = vector.broadcast %c64_i32 : i32 to vector<1x128xi32>
    %16 = arith.cmpi sge, %14, %15 : vector<1x128xi32>
    %c96_i32 = arith.constant 96 : i32
    %17 = vector.broadcast %c96_i32 : i32 to vector<1x128xi32>
    %18 = arith.cmpi slt, %14, %17 : vector<1x128xi32>
    %19 = arith.andi %16, %18 : vector<1x128xi1>
    %cst_10 = arith.constant 2.000000e+00 : f32
    %cst_11 = arith.constant 1.000000e+00 : f32
    %20 = vector.broadcast %cst_10 : f32 to vector<1x128xf32>
    %21 = vector.broadcast %cst_11 : f32 to vector<1x128xf32>
    %22 = arith.select %19, %20, %21 : vector<1x128xi1>, vector<1x128xf32>
    %cst_12 = arith.constant 0.000000e+00 : f32
    %23 = vector.broadcast %cst_12 : f32 to vector<1x32xf32>
    %cst_13 = arith.constant 0.000000e+00 : f32
    %24 = vector.broadcast %cst_13 : f32 to vector<1x128xf32>
    %25 = vector.extract_strided_slice %13 {offsets = [0, 0], sizes = [1, 128], strides = [1, 1]} : vector<8x128xf32> to vector<1x128xf32>
    %cst_14 = arith.constant dense<0.000000e+00> : vector<1x128xf32>
    %26 = tpu.matmul %23, %2, %cst_14 {dimension_numbers = #tpu.dot_dimension_numbers<[1], [0], [0], [1], [0, 0, 1, 1], [], []>} : vector<1x32xf32>, vector<32x128xf32>, vector<1x128xf32> -> vector<1x128xf32>
    %27 = arith.addf %25, %26 : vector<1x128xf32>
    %28 = arith.mulf %27, %22 : vector<1x128xf32>
    %29 = arith.negf %28 : vector<1x128xf32>
    %30 = math.exp %29 : vector<1x128xf32>
    %cst_15 = arith.constant 1.000000e+00 : f32
    %31 = vector.broadcast %cst_15 : f32 to vector<1x128xf32>
    %32 = arith.addf %31, %30 : vector<1x128xf32>
    %33 = arith.divf %31, %32 : vector<1x128xf32>
    %c96_i32_16 = arith.constant 96 : i32
    %34 = tpu.dynamic_rotate %33 by %c96_i32_16 dim 1 : vector<1x128xf32>, i32 -> vector<1x128xf32>
    %c64_i32_17 = arith.constant 64 : i32
    %35 = tpu.dynamic_rotate %33 by %c64_i32_17 dim 1 : vector<1x128xf32>, i32 -> vector<1x128xf32>
    %cst_18 = arith.constant 2.000000e+00 : f32
    %36 = vector.broadcast %cst_18 : f32 to vector<1x128xf32>
    %37 = arith.mulf %36, %35 : vector<1x128xf32>
    %cst_19 = arith.constant 1.000000e+00 : f32
    %38 = vector.broadcast %cst_19 : f32 to vector<1x128xf32>
    %39 = arith.subf %37, %38 : vector<1x128xf32>
    %c32_i32 = arith.constant 32 : i32
    %40 = tpu.dynamic_rotate %33 by %c32_i32 dim 1 : vector<1x128xf32>, i32 -> vector<1x128xf32>
    %41 = arith.mulf %34, %24 : vector<1x128xf32>
    %42 = arith.mulf %33, %39 : vector<1x128xf32>
    %43 = arith.addf %41, %42 : vector<1x128xf32>
    %44 = math.tanh %43 : vector<1x128xf32>
    %45 = arith.mulf %40, %44 : vector<1x128xf32>
    %46 = vector.extract_strided_slice %45 {offsets = [0, 0], sizes = [1, 32], strides = [1, 1]} : vector<1x128xf32> to vector<1x32xf32>
    %c0_20 = arith.constant 0 : index
    %c0_21 = arith.constant 0 : index
    %47 = vector.load %arg8[%c0_20, %c0_21] : memref<8x32xf32, #tpu.memory_space<vmem>>, vector<1x32xf32>
    tpu.vector_store %arg8[%c0_20, %c0_21], %46 {strides = array<i32>} : memref<8x32xf32, #tpu.memory_space<vmem>>, vector<1x32xf32>,
    %48 = vector.extract_strided_slice %13 {offsets = [1, 0], sizes = [1, 128], strides = [1, 1]} : vector<8x128xf32> to vector<1x128xf32>
    %cst_22 = arith.constant dense<0.000000e+00> : vector<1x128xf32>
    %49 = tpu.matmul %46, %2, %cst_22 {dimension_numbers = #tpu.dot_dimension_numbers<[1], [0], [0], [1], [0, 0, 1, 1], [], []>} : vector<1x32xf32>, vector<32x128xf32>, vector<1x128xf32> -> vector<1x128xf32>
    %50 = arith.addf %48, %49 : vector<1x128xf32>
    %51 = arith.mulf %50, %22 : vector<1x128xf32>
    %52 = arith.negf %51 : vector<1x128xf32>
    %53 = math.exp %52 : vector<1x128xf32>
    %cst_23 = arith.constant 1.000000e+00 : f32
    %54 = vector.broadcast %cst_23 : f32 to vector<1x128xf32>
    %55 = arith.addf %54, %53 : vector<1x128xf32>
    %56 = arith.divf %54, %55 : vector<1x128xf32>
    %c96_i32_24 = arith.constant 96 : i32
    %57 = tpu.dynamic_rotate %56 by %c96_i32_24 dim 1 : vector<1x128xf32>, i32 -> vector<1x128xf32>
    %c64_i32_25 = arith.constant 64 : i32
    %58 = tpu.dynamic_rotate %56 by %c64_i32_25 dim 1 : vector<1x128xf32>, i32 -> vector<1x128xf32>
    %cst_26 = arith.constant 2.000000e+00 : f32
    %59 = vector.broadcast %cst_26 : f32 to vector<1x128xf32>
    %60 = arith.mulf %59, %58 : vector<1x128xf32>
    %cst_27 = arith.constant 1.000000e+00 : f32
    %61 = vector.broadcast %cst_27 : f32 to vector<1x128xf32>
    %62 = arith.subf %60, %61 : vector<1x128xf32>
    %c32_i32_28 = arith.constant 32 : i32
    %63 = tpu.dynamic_rotate %56 by %c32_i32_28 dim 1 : vector<1x128xf32>, i32 -> vector<1x128xf32>
    %64 = arith.mulf %57, %43 : vector<1x128xf32>
    %65 = arith.mulf %56, %62 : vector<1x128xf32>
    %66 = arith.addf %64, %65 : vector<1x128xf32>
    %67 = math.tanh %66 : vector<1x128xf32>
    %68 = arith.mulf %63, %67 : vector<1x128xf32>
    %69 = vector.extract_strided_slice %68 {offsets = [0, 0], sizes = [1, 32], strides = [1, 1]} : vector<1x128xf32> to vector<1x32xf32>
    %c1 = arith.constant 1 : index
    %c0_29 = arith.constant 0 : index
    %70 = vector.load %arg8[%c1, %c0_29] : memref<8x32xf32, #tpu.memory_space<vmem>>, vector<1x32xf32>
    tpu.vector_store %arg8[%c1, %c0_29], %69 {strides = array<i32>} : memref<8x32xf32, #tpu.memory_space<vmem>>, vector<1x32xf32>,
    %71 = vector.extract_strided_slice %13 {offsets = [2, 0], sizes = [1, 128], strides = [1, 1]} : vector<8x128xf32> to vector<1x128xf32>
    %cst_30 = arith.constant dense<0.000000e+00> : vector<1x128xf32>
    %72 = tpu.matmul %69, %2, %cst_30 {dimension_numbers = #tpu.dot_dimension_numbers<[1], [0], [0], [1], [0, 0, 1, 1], [], []>} : vector<1x32xf32>, vector<32x128xf32>, vector<1x128xf32> -> vector<1x128xf32>
    %73 = arith.addf %71, %72 : vector<1x128xf32>
    %74 = arith.mulf %73, %22 : vector<1x128xf32>
    %75 = arith.negf %74 : vector<1x128xf32>
    %76 = math.exp %75 : vector<1x128xf32>
    %cst_31 = arith.constant 1.000000e+00 : f32
    %77 = vector.broadcast %cst_31 : f32 to vector<1x128xf32>
    %78 = arith.addf %77, %76 : vector<1x128xf32>
    %79 = arith.divf %77, %78 : vector<1x128xf32>
    %c96_i32_32 = arith.constant 96 : i32
    %80 = tpu.dynamic_rotate %79 by %c96_i32_32 dim 1 : vector<1x128xf32>, i32 -> vector<1x128xf32>
    %c64_i32_33 = arith.constant 64 : i32
    %81 = tpu.dynamic_rotate %79 by %c64_i32_33 dim 1 : vector<1x128xf32>, i32 -> vector<1x128xf32>
    %cst_34 = arith.constant 2.000000e+00 : f32
    %82 = vector.broadcast %cst_34 : f32 to vector<1x128xf32>
    %83 = arith.mulf %82, %81 : vector<1x128xf32>
    %cst_35 = arith.constant 1.000000e+00 : f32
    %84 = vector.broadcast %cst_35 : f32 to vector<1x128xf32>
    %85 = arith.subf %83, %84 : vector<1x128xf32>
    %c32_i32_36 = arith.constant 32 : i32
    %86 = tpu.dynamic_rotate %79 by %c32_i32_36 dim 1 : vector<1x128xf32>, i32 -> vector<1x128xf32>
    %87 = arith.mulf %80, %66 : vector<1x128xf32>
    %88 = arith.mulf %79, %85 : vector<1x128xf32>
    %89 = arith.addf %87, %88 : vector<1x128xf32>
    %90 = math.tanh %89 : vector<1x128xf32>
    %91 = arith.mulf %86, %90 : vector<1x128xf32>
    %92 = vector.extract_strided_slice %91 {offsets = [0, 0], sizes = [1, 32], strides = [1, 1]} : vector<1x128xf32> to vector<1x32xf32>
    %c2 = arith.constant 2 : index
    %c0_37 = arith.constant 0 : index
    %93 = vector.load %arg8[%c2, %c0_37] : memref<8x32xf32, #tpu.memory_space<vmem>>, vector<1x32xf32>
    tpu.vector_store %arg8[%c2, %c0_37], %92 {strides = array<i32>} : memref<8x32xf32, #tpu.memory_space<vmem>>, vector<1x32xf32>,
    %94 = vector.extract_strided_slice %13 {offsets = [3, 0], sizes = [1, 128], strides = [1, 1]} : vector<8x128xf32> to vector<1x128xf32>
    %cst_38 = arith.constant dense<0.000000e+00> : vector<1x128xf32>
    %95 = tpu.matmul %92, %2, %cst_38 {dimension_numbers = #tpu.dot_dimension_numbers<[1], [0], [0], [1], [0, 0, 1, 1], [], []>} : vector<1x32xf32>, vector<32x128xf32>, vector<1x128xf32> -> vector<1x128xf32>
    %96 = arith.addf %94, %95 : vector<1x128xf32>
    %97 = arith.mulf %96, %22 : vector<1x128xf32>
    %98 = arith.negf %97 : vector<1x128xf32>
    %99 = math.exp %98 : vector<1x128xf32>
    %cst_39 = arith.constant 1.000000e+00 : f32
    %100 = vector.broadcast %cst_39 : f32 to vector<1x128xf32>
    %101 = arith.addf %100, %99 : vector<1x128xf32>
    %102 = arith.divf %100, %101 : vector<1x128xf32>
    %c96_i32_40 = arith.constant 96 : i32
    %103 = tpu.dynamic_rotate %102 by %c96_i32_40 dim 1 : vector<1x128xf32>, i32 -> vector<1x128xf32>
    %c64_i32_41 = arith.constant 64 : i32
    %104 = tpu.dynamic_rotate %102 by %c64_i32_41 dim 1 : vector<1x128xf32>, i32 -> vector<1x128xf32>
    %cst_42 = arith.constant 2.000000e+00 : f32
    %105 = vector.broadcast %cst_42 : f32 to vector<1x128xf32>
    %106 = arith.mulf %105, %104 : vector<1x128xf32>
    %cst_43 = arith.constant 1.000000e+00 : f32
    %107 = vector.broadcast %cst_43 : f32 to vector<1x128xf32>
    %108 = arith.subf %106, %107 : vector<1x128xf32>
    %c32_i32_44 = arith.constant 32 : i32
    %109 = tpu.dynamic_rotate %102 by %c32_i32_44 dim 1 : vector<1x128xf32>, i32 -> vector<1x128xf32>
    %110 = arith.mulf %103, %89 : vector<1x128xf32>
    %111 = arith.mulf %102, %108 : vector<1x128xf32>
    %112 = arith.addf %110, %111 : vector<1x128xf32>
    %113 = math.tanh %112 : vector<1x128xf32>
    %114 = arith.mulf %109, %113 : vector<1x128xf32>
    %115 = vector.extract_strided_slice %114 {offsets = [0, 0], sizes = [1, 32], strides = [1, 1]} : vector<1x128xf32> to vector<1x32xf32>
    %c3 = arith.constant 3 : index
    %c0_45 = arith.constant 0 : index
    %116 = vector.load %arg8[%c3, %c0_45] : memref<8x32xf32, #tpu.memory_space<vmem>>, vector<1x32xf32>
    tpu.vector_store %arg8[%c3, %c0_45], %115 {strides = array<i32>} : memref<8x32xf32, #tpu.memory_space<vmem>>, vector<1x32xf32>,
    %117 = vector.extract_strided_slice %13 {offsets = [4, 0], sizes = [1, 128], strides = [1, 1]} : vector<8x128xf32> to vector<1x128xf32>
    %cst_46 = arith.constant dense<0.000000e+00> : vector<1x128xf32>
    %118 = tpu.matmul %115, %2, %cst_46 {dimension_numbers = #tpu.dot_dimension_numbers<[1], [0], [0], [1], [0, 0, 1, 1], [], []>} : vector<1x32xf32>, vector<32x128xf32>, vector<1x128xf32> -> vector<1x128xf32>
    %119 = arith.addf %117, %118 : vector<1x128xf32>
    %120 = arith.mulf %119, %22 : vector<1x128xf32>
    %121 = arith.negf %120 : vector<1x128xf32>
    %122 = math.exp %121 : vector<1x128xf32>
    %cst_47 = arith.constant 1.000000e+00 : f32
    %123 = vector.broadcast %cst_47 : f32 to vector<1x128xf32>
    %124 = arith.addf %123, %122 : vector<1x128xf32>
    %125 = arith.divf %123, %124 : vector<1x128xf32>
    %c96_i32_48 = arith.constant 96 : i32
    %126 = tpu.dynamic_rotate %125 by %c96_i32_48 dim 1 : vector<1x128xf32>, i32 -> vector<1x128xf32>
    %c64_i32_49 = arith.constant 64 : i32
    %127 = tpu.dynamic_rotate %125 by %c64_i32_49 dim 1 : vector<1x128xf32>, i32 -> vector<1x128xf32>
    %cst_50 = arith.constant 2.000000e+00 : f32
    %128 = vector.broadcast %cst_50 : f32 to vector<1x128xf32>
    %129 = arith.mulf %128, %127 : vector<1x128xf32>
    %cst_51 = arith.constant 1.000000e+00 : f32
    %130 = vector.broadcast %cst_51 : f32 to vector<1x128xf32>
    %131 = arith.subf %129, %130 : vector<1x128xf32>
    %c32_i32_52 = arith.constant 32 : i32
    %132 = tpu.dynamic_rotate %125 by %c32_i32_52 dim 1 : vector<1x128xf32>, i32 -> vector<1x128xf32>
    %133 = arith.mulf %126, %112 : vector<1x128xf32>
    %134 = arith.mulf %125, %131 : vector<1x128xf32>
    %135 = arith.addf %133, %134 : vector<1x128xf32>
    %136 = math.tanh %135 : vector<1x128xf32>
    %137 = arith.mulf %132, %136 : vector<1x128xf32>
    %138 = vector.extract_strided_slice %137 {offsets = [0, 0], sizes = [1, 32], strides = [1, 1]} : vector<1x128xf32> to vector<1x32xf32>
    %c4 = arith.constant 4 : index
    %c0_53 = arith.constant 0 : index
    %139 = vector.load %arg8[%c4, %c0_53] : memref<8x32xf32, #tpu.memory_space<vmem>>, vector<1x32xf32>
    tpu.vector_store %arg8[%c4, %c0_53], %138 {strides = array<i32>} : memref<8x32xf32, #tpu.memory_space<vmem>>, vector<1x32xf32>,
    %140 = vector.extract_strided_slice %13 {offsets = [5, 0], sizes = [1, 128], strides = [1, 1]} : vector<8x128xf32> to vector<1x128xf32>
    %cst_54 = arith.constant dense<0.000000e+00> : vector<1x128xf32>
    %141 = tpu.matmul %138, %2, %cst_54 {dimension_numbers = #tpu.dot_dimension_numbers<[1], [0], [0], [1], [0, 0, 1, 1], [], []>} : vector<1x32xf32>, vector<32x128xf32>, vector<1x128xf32> -> vector<1x128xf32>
    %142 = arith.addf %140, %141 : vector<1x128xf32>
    %143 = arith.mulf %142, %22 : vector<1x128xf32>
    %144 = arith.negf %143 : vector<1x128xf32>
    %145 = math.exp %144 : vector<1x128xf32>
    %cst_55 = arith.constant 1.000000e+00 : f32
    %146 = vector.broadcast %cst_55 : f32 to vector<1x128xf32>
    %147 = arith.addf %146, %145 : vector<1x128xf32>
    %148 = arith.divf %146, %147 : vector<1x128xf32>
    %c96_i32_56 = arith.constant 96 : i32
    %149 = tpu.dynamic_rotate %148 by %c96_i32_56 dim 1 : vector<1x128xf32>, i32 -> vector<1x128xf32>
    %c64_i32_57 = arith.constant 64 : i32
    %150 = tpu.dynamic_rotate %148 by %c64_i32_57 dim 1 : vector<1x128xf32>, i32 -> vector<1x128xf32>
    %cst_58 = arith.constant 2.000000e+00 : f32
    %151 = vector.broadcast %cst_58 : f32 to vector<1x128xf32>
    %152 = arith.mulf %151, %150 : vector<1x128xf32>
    %cst_59 = arith.constant 1.000000e+00 : f32
    %153 = vector.broadcast %cst_59 : f32 to vector<1x128xf32>
    %154 = arith.subf %152, %153 : vector<1x128xf32>
    %c32_i32_60 = arith.constant 32 : i32
    %155 = tpu.dynamic_rotate %148 by %c32_i32_60 dim 1 : vector<1x128xf32>, i32 -> vector<1x128xf32>
    %156 = arith.mulf %149, %135 : vector<1x128xf32>
    %157 = arith.mulf %148, %154 : vector<1x128xf32>
    %158 = arith.addf %156, %157 : vector<1x128xf32>
    %159 = math.tanh %158 : vector<1x128xf32>
    %160 = arith.mulf %155, %159 : vector<1x128xf32>
    %161 = vector.extract_strided_slice %160 {offsets = [0, 0], sizes = [1, 32], strides = [1, 1]} : vector<1x128xf32> to vector<1x32xf32>
    %c5 = arith.constant 5 : index
    %c0_61 = arith.constant 0 : index
    %162 = vector.load %arg8[%c5, %c0_61] : memref<8x32xf32, #tpu.memory_space<vmem>>, vector<1x32xf32>
    tpu.vector_store %arg8[%c5, %c0_61], %161 {strides = array<i32>} : memref<8x32xf32, #tpu.memory_space<vmem>>, vector<1x32xf32>,
    %163 = vector.extract_strided_slice %13 {offsets = [6, 0], sizes = [1, 128], strides = [1, 1]} : vector<8x128xf32> to vector<1x128xf32>
    %cst_62 = arith.constant dense<0.000000e+00> : vector<1x128xf32>
    %164 = tpu.matmul %161, %2, %cst_62 {dimension_numbers = #tpu.dot_dimension_numbers<[1], [0], [0], [1], [0, 0, 1, 1], [], []>} : vector<1x32xf32>, vector<32x128xf32>, vector<1x128xf32> -> vector<1x128xf32>
    %165 = arith.addf %163, %164 : vector<1x128xf32>
    %166 = arith.mulf %165, %22 : vector<1x128xf32>
    %167 = arith.negf %166 : vector<1x128xf32>
    %168 = math.exp %167 : vector<1x128xf32>
    %cst_63 = arith.constant 1.000000e+00 : f32
    %169 = vector.broadcast %cst_63 : f32 to vector<1x128xf32>
    %170 = arith.addf %169, %168 : vector<1x128xf32>
    %171 = arith.divf %169, %170 : vector<1x128xf32>
    %c96_i32_64 = arith.constant 96 : i32
    %172 = tpu.dynamic_rotate %171 by %c96_i32_64 dim 1 : vector<1x128xf32>, i32 -> vector<1x128xf32>
    %c64_i32_65 = arith.constant 64 : i32
    %173 = tpu.dynamic_rotate %171 by %c64_i32_65 dim 1 : vector<1x128xf32>, i32 -> vector<1x128xf32>
    %cst_66 = arith.constant 2.000000e+00 : f32
    %174 = vector.broadcast %cst_66 : f32 to vector<1x128xf32>
    %175 = arith.mulf %174, %173 : vector<1x128xf32>
    %cst_67 = arith.constant 1.000000e+00 : f32
    %176 = vector.broadcast %cst_67 : f32 to vector<1x128xf32>
    %177 = arith.subf %175, %176 : vector<1x128xf32>
    %c32_i32_68 = arith.constant 32 : i32
    %178 = tpu.dynamic_rotate %171 by %c32_i32_68 dim 1 : vector<1x128xf32>, i32 -> vector<1x128xf32>
    %179 = arith.mulf %172, %158 : vector<1x128xf32>
    %180 = arith.mulf %171, %177 : vector<1x128xf32>
    %181 = arith.addf %179, %180 : vector<1x128xf32>
    %182 = math.tanh %181 : vector<1x128xf32>
    %183 = arith.mulf %178, %182 : vector<1x128xf32>
    %184 = vector.extract_strided_slice %183 {offsets = [0, 0], sizes = [1, 32], strides = [1, 1]} : vector<1x128xf32> to vector<1x32xf32>
    %c6 = arith.constant 6 : index
    %c0_69 = arith.constant 0 : index
    %185 = vector.load %arg8[%c6, %c0_69] : memref<8x32xf32, #tpu.memory_space<vmem>>, vector<1x32xf32>
    tpu.vector_store %arg8[%c6, %c0_69], %184 {strides = array<i32>} : memref<8x32xf32, #tpu.memory_space<vmem>>, vector<1x32xf32>,
    %186 = vector.extract_strided_slice %13 {offsets = [7, 0], sizes = [1, 128], strides = [1, 1]} : vector<8x128xf32> to vector<1x128xf32>
    %cst_70 = arith.constant dense<0.000000e+00> : vector<1x128xf32>
    %187 = tpu.matmul %184, %2, %cst_70 {dimension_numbers = #tpu.dot_dimension_numbers<[1], [0], [0], [1], [0, 0, 1, 1], [], []>} : vector<1x32xf32>, vector<32x128xf32>, vector<1x128xf32> -> vector<1x128xf32>
    %188 = arith.addf %186, %187 : vector<1x128xf32>
    %189 = arith.mulf %188, %22 : vector<1x128xf32>
    %190 = arith.negf %189 : vector<1x128xf32>
    %191 = math.exp %190 : vector<1x128xf32>
    %cst_71 = arith.constant 1.000000e+00 : f32
    %192 = vector.broadcast %cst_71 : f32 to vector<1x128xf32>
    %193 = arith.addf %192, %191 : vector<1x128xf32>
    %194 = arith.divf %192, %193 : vector<1x128xf32>
    %c96_i32_72 = arith.constant 96 : i32
    %195 = tpu.dynamic_rotate %194 by %c96_i32_72 dim 1 : vector<1x128xf32>, i32 -> vector<1x128xf32>
    %c64_i32_73 = arith.constant 64 : i32
    %196 = tpu.dynamic_rotate %194 by %c64_i32_73 dim 1 : vector<1x128xf32>, i32 -> vector<1x128xf32>
    %cst_74 = arith.constant 2.000000e+00 : f32
    %197 = vector.broadcast %cst_74 : f32 to vector<1x128xf32>
    %198 = arith.mulf %197, %196 : vector<1x128xf32>
    %cst_75 = arith.constant 1.000000e+00 : f32
    %199 = vector.broadcast %cst_75 : f32 to vector<1x128xf32>
    %200 = arith.subf %198, %199 : vector<1x128xf32>
    %c32_i32_76 = arith.constant 32 : i32
    %201 = tpu.dynamic_rotate %194 by %c32_i32_76 dim 1 : vector<1x128xf32>, i32 -> vector<1x128xf32>
    %202 = arith.mulf %195, %181 : vector<1x128xf32>
    %203 = arith.mulf %194, %200 : vector<1x128xf32>
    %204 = arith.addf %202, %203 : vector<1x128xf32>
    %205 = math.tanh %204 : vector<1x128xf32>
    %206 = arith.mulf %201, %205 : vector<1x128xf32>
    %207 = vector.extract_strided_slice %206 {offsets = [0, 0], sizes = [1, 32], strides = [1, 1]} : vector<1x128xf32> to vector<1x32xf32>
    %c7 = arith.constant 7 : index
    %c0_77 = arith.constant 0 : index
    %208 = vector.load %arg8[%c7, %c0_77] : memref<8x32xf32, #tpu.memory_space<vmem>>, vector<1x32xf32>
    tpu.vector_store %arg8[%c7, %c0_77], %207 {strides = array<i32>} : memref<8x32xf32, #tpu.memory_space<vmem>>, vector<1x32xf32>,
    %c0_78 = arith.constant 0 : index
    %c0_79 = arith.constant 0 : index
    %209 = vector.load %arg5[%c0_78, %c0_79] : memref<32x8xf32, #tpu.memory_space<vmem>>, vector<32x8xf32>
    %c0_80 = arith.constant 0 : index
    %c0_81 = arith.constant 0 : index
    %210 = vector.load %arg6[%c0_80, %c0_81] : memref<1x8xf32, #tpu.memory_space<vmem>>, vector<1x8xf32>
    %c0_82 = arith.constant 0 : index
    %c0_83 = arith.constant 0 : index
    %211 = vector.load %arg8[%c0_82, %c0_83] : memref<8x32xf32, #tpu.memory_space<vmem>>, vector<8x32xf32>
    %cst_84 = arith.constant dense<0.000000e+00> : vector<8x8xf32>
    %212 = tpu.matmul %211, %209, %cst_84 {dimension_numbers = #tpu.dot_dimension_numbers<[1], [0], [0], [1], [0, 0, 1, 1], [], []>} : vector<8x32xf32>, vector<32x8xf32>, vector<8x8xf32> -> vector<8x8xf32>
    %213 = vector.broadcast %210 : vector<1x8xf32> to vector<8x8xf32>
    %214 = arith.addf %212, %213 : vector<8x8xf32>
    %cst_85 = arith.constant dense<0xFF800000> : vector<8xf32>
    %215 = vector.multi_reduction <maximumf>, %214, %cst_85 [1] : vector<8x8xf32> to vector<8xf32>
    %216 = vector.shape_cast %215 : vector<8xf32> to vector<8x1xf32>
    %217 = vector.broadcast %216 : vector<8x1xf32> to vector<8x8xf32>
    %218 = arith.subf %214, %217 : vector<8x8xf32>
    %219 = math.exp %218 : vector<8x8xf32>
    %cst_86 = arith.constant dense<0.000000e+00> : vector<8xf32>
    %220 = vector.multi_reduction <add>, %219, %cst_86 [1] : vector<8x8xf32> to vector<8xf32>
    %221 = vector.shape_cast %220 : vector<8xf32> to vector<8x1xf32>
    %222 = math.log %221 : vector<8x1xf32>
    %223 = vector.broadcast %222 : vector<8x1xf32> to vector<8x8xf32>
    %224 = arith.subf %218, %223 : vector<8x8xf32>
    %c0_87 = arith.constant 0 : index
    %c0_88 = arith.constant 0 : index
    %225 = vector.load %arg7[%c0_87, %c0_88] : memref<8x8xf32, #tpu.memory_space<vmem>>, vector<8x8xf32>
    tpu.vector_store %arg7[%c0_87, %c0_88], %224 {strides = array<i32>} : memref<8x8xf32, #tpu.memory_space<vmem>>, vector<8x8xf32>,
    return
  }
}

</mosaic_0001>

<bundles_post_ra>
// kernel: lstm_tagger_pallas.1
= control target key start
LH: loop header
LB: loop body
LE: loop exit
PB: predicated region body
PF: predicated region fallthrough
CT: control target
= control target key end

     0   :  { %v1500_v3 = vmov 0   ;;  %v1501_v4 = vmov 0.0|0.0   ;;  %s1733_s0 = inlined_call_operand.vmem [shape: s32[8,1], index: 0, kind: input, shape index: {}]   ;;  %s1734_s1 = inlined_call_operand.vmem [shape: f32[16,16], index: 1, kind: input, shape index: {}]   ;;  %s1735_s2 = inlined_call_operand.vmem [shape: f32[16,128], index: 2, kind: input, shape index: {}]   ;;  %s1736_s3 = inlined_call_operand.vmem [shape: f32[32,128], index: 3, kind: input, shape index: {}]   ;;  %s1737_s4 = inlined_call_operand.vmem [shape: f32[1,128], index: 4, kind: input, shape index: {}]   ;;  %s1738_s5 = inlined_call_operand.vmem [shape: f32[32,8], index: 5, kind: input, shape index: {}]   ;;  %s1739_s6 = inlined_call_operand.vmem [shape: f32[1,8], index: 6, kind: input, shape index: {}]   ;;  %s1740_s7 = inlined_call_operand.hbm [shape: f32[8,8], index: 7, kind: output, shape index: {}]  }
   0x1   :  { %v36_v0 = vld [vmem:[%s1733_s0] sm:$0xff]  ;;  %v28_v2 = vld [vmem:[%s1734_s1 + $0x8] sm:$0xff]  ;;  %1423 = vset.pattern.permute.xlu0 %v1500_v3  ;;  %1354 = vmatprep.subr.bf16.mxu1 %v1501_v4 }
   0x2   :  { %v27_v1 = vld [vmem:[%s1734_s1] sm:$0xff] }
   0x3   :  { %v1355_v5 = vpack.c.bf16 %v28_v2, %v27_v1 }
   0x4   :  { %12 = vsyncpa [#allocation4], 0  ;;  %40 = vperm.xlu0 %1423, %v36_v0   ;;  %1360 = vmatprep.subr.bf16.mxu0 %v1501_v4  ;;  %vm1502_vm0 = vmmov 0   ;;  %v1503_v6 = vmov 0.0   ;;  %v31_v7 = vld [vmem:[%s1736_s3] sm:$0xff]  ;;  %v32_v8 = vld [vmem:[%s1736_s3 + $0x8] sm:$0xff]  ;;  %v37_v13 = vlaneseq }
   0x5   :  { %1356 = vmatpush3.bf16.msra.mxu1 %v1355_v5  ;;  %1245 = vmatprep.mubr.msk.f32.mxu1 %vm1502_vm0, %v1503_v6  ;;  %v1571_v9 = vpack.c.bf16 %v32_v8, %v31_v7  ;;  %v33_v10 = vld [vmem:[%s1736_s3 + $0x10] sm:$0xff]  ;;  %v34_v11 = vld [vmem:[%s1736_s3 + $0x18] sm:$0xff]  ;;  %v29_v15 = vld [vmem:[%s1735_s2] sm:$0xff]  ;;  %vm45_vm1 = vcmask 130048   ;;  %v1504_v28 = vmov 1.0   ;;  %s1505_s17 = smov 96  }
   0x6   :  { %1357 = vmatprep.subr.bf16.mxu1 %v1501_v4  ;;  %1263 = vmatprep.mubr.msk.f32.mxu0 %vm1502_vm0, %v1503_v6  ;;  %v1580_v12 = vpack.c.bf16 %v34_v11, %v33_v10  ;;  %v38_v14 = vand.u32 127, %v37_v13  ;;  %v30_v16 = vld [vmem:[%s1735_s2 + $0x8] sm:$0xff]  ;;  %v1163_v24 = vld [vmem:[%s1737_s4] ss:$0 sm:$0xff]  ;;  %s1506_s4 = smov 64   ;;  %s1507_s18 = smov 32  }
   0x7   :  { %1362 = vmatpush3.bf16.msra.mxu0 %v1571_v9  ;;  %v1358_v18 = vpack.c.bf16 %v30_v16, %v29_v15  ;;  %vm297_vm6 = vcmask 253952   ;;  %vm202_vm7 = vcmask 261120   ;;  %vm1133_vm8 = vcmask 64512   ;;  %s1508_s28 = smov [#allocation3]  }
   0x8   :  { %1363 = vmatprep.subr.bf16.mxu0 %v1501_v4  ;;  %vm198_vm3 = vcmp.ge.s32.totalorder %v38_v14, 64  ;;  %vm199_vm4 = vcmp.lt.s32.totalorder %v38_v14, 96 }
   0x9   :  { %vm200_vm5 = vmand %vm198_vm3, %vm199_vm4 }
   0xa   :  { %v1613_v29 = vsel %vm200_vm5, 2.0, %v1504_v28 }
   0xb   :  { %1365 = vmatpush3.bf16.msra.mxu0 %v1580_v12 }
   0xc   :  { %1372 = vmatprep.subr.bf16.mxu0 %v1501_v4 }
   0xe   :  { %1264 = vmatmul.mubr.f32.vlgmr.msra.gmra.mrb[0].mxu0 %v1503_v6 }
   0xf   :  { %1374 = vmatpush3.bf16.msra.mxu0 %v1571_v9  ;;  %1285 = vmatprep.mubr.msk.f32.mxu0 %vm1502_vm0, %v1503_v6 }
  0x10   :  { %1375 = vmatprep.subr.bf16.mxu0 %v1501_v4 }
  0x13   :  { %1377 = vmatpush3.bf16.msra.mxu0 %v1580_v12 }
  0x14   :  { %1384 = vmatprep.subr.bf16.mxu0 %v1501_v4 }
  0x83   :  { %v41_v17 = vpop.permute.xlu0 %40 }
  0x84   :  { %vm42_vm2 = vcmp.eq.s32.totalorder %v38_v14, %v41_v17 }
  0x85   :  { %v1161_v19 = vsel %vm42_vm2, 1.0, %v1503_v6 }
  0x86   :  { %1246 = vmatmul.mubr.msk.f32.vlgmr.msra.gmra.mrb[0].mxu1 %vm45_vm1, %v1161_v19 }
  0x87   :  { %1359 = vmatpush3.bf16.msra.mxu1 %v1358_v18  ;;  %1252 = vmatprep.mubr.msk.f32.mxu1 %vm1502_vm0, %v1503_v6 }
  0x88   :  { %1366 = vmatprep.subr.bf16.mxu1 %v1501_v4 }
  0xe1   :  { %v272_v22 = vpop.f32.mrb[0].mxu0 }
  0xe2   :  { %v1265_v23 = vpop.f32.mrb[1].mxu0 }
 0x159   :  { %v115_v20 = vpop.f32.mrb[0].mxu1 }
 0x15a   :  { %v1247_v21 = vpop.f32.mrb[1].mxu1  ;;  %1253 = vmatmul.mubr.msk.f32.vlgmr.msra.gmra.mrb[2].mxu1 %vm45_vm1, %v115_v20 }
 0x15b   :  { %1368 = vmatpush3.bf16.msra.mxu1 %v1571_v9  ;;  %1274 = vmatprep.mubr.msk.f32.mxu1 %vm1502_vm0, %v1503_v6 }
 0x15c   :  { %1369 = vmatprep.subr.bf16.mxu1 %v1501_v4 }
 0x15f   :  { %1371 = vmatpush3.bf16.msra.mxu1 %v1580_v12 }
 0x160   :  { %1378 = vmatprep.subr.bf16.mxu1 %v1501_v4 }
 0x22d   :  { %v194_v25 = vpop.f32.mrb[2].mxu1 }
 0x22e   :  { %v1611_v26 = vadd.f32 %v1163_v24, %v194_v25  ;;  %v1254_v27 = vpop.f32.mrb[3].mxu1 }
 0x230   :  { %v276_v30 = vadd.f32 %v272_v22, %v1611_v26 }
 0x232   :  { %v277_v31 = vmul.f32 %v276_v30, %v1613_v29 }
 0x234   :  { %v1165_v32 = vmul.f32 -1.442695, %v277_v31 }
 0x236   :  { %1424 = vpow2.f32 %v1165_v32 }
 0x240   :  { %v1425_v33 = vpop.eup %1424 }
 0x241   :  { %v281_v34 = vadd.f32 1.0, %v1425_v33 }
 0x243   :  { %1426 = vrcp.f32 %v281_v34 }
 0x24d   :  { %v1427_v35 = vpop.eup %1426 }
 0x24e   :  { %284 = vrot.lane.b32.xlu1 %v1427_v35, %s1505_s17  ;;  %286 = vrot.lane.b32.xlu0 %v1427_v35, %s1506_s4 }
 0x252   :  { %290 = vrot.lane.b32.xlu1 %v1427_v35, %s1507_s18 }
 0x2c0   :  { %v287_v36 = vpop.permute.xlu0 %286  ;;  %v285_v38 = vpop.permute.xlu1 %284 }
 0x2c1   :  { %v288_v37 = vmul.f32 2.0, %v287_v36  ;;  %v292_v40 = vmul.f32 0.0, %v285_v38 }
 0x2c3   :  { %v1166_v39 = vadd.f32 -1.0, %v288_v37 }
 0x2c4   :  { %v291_v44 = vpop.permute.xlu1 %290 }
 0x2c5   :  { %v293_v41 = vmul.f32 %v1427_v35, %v1166_v39 }
 0x2c7   :  { %v294_v42 = vadd.f32 %v293_v41, %v292_v40 }
 0x2c9   :  { %1428 = vtanh.f32 %v294_v42 }
 0x2d3   :  { %v1429_v43 = vpop.eup %1428 }
 0x2d4   :  { %v296_v45 = vmul.f32 %v1429_v43, %v291_v44 }
 0x2d6   :  { %298 = vst.msk [vmem:[#allocation2] sm:$0x1] %vm297_vm6, %v296_v45  ;;  %1275 = vmatmul.mubr.msk.f32.vlgmr.msra.gmra.mrb[4].mxu1 %vm202_vm7, %v296_v45 }
 0x2d7   :  { %1380 = vmatpush3.bf16.msra.mxu1 %v1571_v9  ;;  %1296 = vmatprep.mubr.msk.f32.mxu1 %vm1502_vm0, %v1503_v6 }
 0x2d8   :  { %1381 = vmatprep.subr.bf16.mxu1 %v1501_v4 }
 0x2db   :  { %1383 = vmatpush3.bf16.msra.mxu1 %v1580_v12 }
 0x2dc   :  { %1390 = vmatprep.subr.bf16.mxu1 %v1501_v4 }
 0x3a9   :  { %v368_v46 = vpop.f32.mrb[4].mxu1 }
 0x3aa   :  { %v373_v47 = vrot.slane %v368_v46, 7  ;;  %v1276_v48 = vpop.f32.mrb[5].mxu1 }
 0x3ac   :  { %v375_v49 = vadd.f32 %v373_v47, %v1611_v26 }
 0x3ae   :  { %v376_v50 = vmul.f32 %v375_v49, %v1613_v29 }
 0x3b0   :  { %v1168_v51 = vmul.f32 -1.442695, %v376_v50 }
 0x3b2   :  { %1430 = vpow2.f32 %v1168_v51 }
 0x3bc   :  { %v1431_v52 = vpop.eup %1430 }
 0x3bd   :  { %v380_v53 = vadd.f32 1.0, %v1431_v52 }
 0x3bf   :  { %1432 = vrcp.f32 %v380_v53 }
 0x3c9   :  { %v1433_v54 = vpop.eup %1432 }
 0x3ca   :  { %v384_v55 = vrot.slane %v1433_v54, 1 }
 0x3cc   :  { %386 = vrot.lane.b32.xlu1 %v384_v55, %s1505_s17  ;;  %388 = vrot.lane.b32.xlu0 %v384_v55, %s1506_s4 }
 0x3d0   :  { %392 = vrot.lane.b32.xlu0 %v384_v55, %s1507_s18 }
 0x43e   :  { %v389_v56 = vpop.permute.xlu0 %388  ;;  %v387_v60 = vpop.permute.xlu1 %386 }
 0x43f   :  { %v390_v57 = vmul.f32 2.0, %v389_v56  ;;  %v394_v62 = vmul.f32 %v387_v60, %v294_v42 }
 0x441   :  { %v1169_v58 = vadd.f32 -1.0, %v390_v57 }
 0x442   :  { %v393_v2 = vpop.permute.xlu0 %392 }
 0x443   :  { %v396_v59 = vrot.slane %v1169_v58, 7 }
 0x445   :  { %v398_v61 = vmul.f32 %v1433_v54, %v396_v59 }
 0x447   :  { %v400_v63 = vrot.slane %v398_v61, 1 }
 0x449   :  { %v402_v0 = vadd.f32 %v400_v63, %v394_v62 }
 0x44b   :  { %1434 = vtanh.f32 %v402_v0 }
 0x455   :  { %v1435_v1 = vpop.eup %1434 }
 0x456   :  { %v404_v3 = vmul.f32 %v1435_v1, %v393_v2 }
 0x458   :  { %405 = vst.msk [vmem:[#allocation2 + $0x1] sm:$0x1] %vm297_vm6, %v404_v3  ;;  %1286 = vmatmul.mubr.msk.f32.vlgmr.msra.gmra.mrb[2].mxu0 %vm202_vm7, %v404_v3 }
 0x459   :  { %1386 = vmatpush3.bf16.msra.mxu0 %v1571_v9  ;;  %1307 = vmatprep.mubr.msk.f32.mxu0 %vm1502_vm0, %v1503_v6 }
 0x45a   :  { %1387 = vmatprep.subr.bf16.mxu0 %v1501_v4 }
 0x45d   :  { %1389 = vmatpush3.bf16.msra.mxu0 %v1580_v12 }
 0x45e   :  { %1396 = vmatprep.subr.bf16.mxu0 %v1501_v4 }
 0x52b   :  { %v475_v5 = vpop.f32.mrb[2].mxu0 }
 0x52c   :  { %v480_v7 = vrot.slane %v475_v5, 6  ;;  %v1287_v8 = vpop.f32.mrb[3].mxu0 }
 0x52e   :  { %v482_v10 = vadd.f32 %v480_v7, %v1611_v26 }
 0x530   :  { %v483_v11 = vmul.f32 %v482_v10, %v1613_v29 }
 0x532   :  { %v1171_v13 = vmul.f32 -1.442695, %v483_v11 }
 0x534   :  { %1436 = vpow2.f32 %v1171_v13 }
 0x53e   :  { %v1437_v14 = vpop.eup %1436 }
 0x53f   :  { %v487_v15 = vadd.f32 1.0, %v1437_v14 }
 0x541   :  { %1438 = vrcp.f32 %v487_v15 }
 0x54b   :  { %v1439_v16 = vpop.eup %1438 }
 0x54c   :  { %v491_v17 = vrot.slane %v1439_v16, 2 }
 0x54e   :  { %493 = vrot.lane.b32.xlu0 %v491_v17, %s1505_s17  ;;  %495 = vrot.lane.b32.xlu1 %v491_v17, %s1506_s4 }
 0x552   :  { %499 = vrot.lane.b32.xlu1 %v491_v17, %s1507_s18 }
 0x5c0   :  { %v496_v18 = vpop.permute.xlu1 %495  ;;  %v494_v22 = vpop.permute.xlu0 %493 }
 0x5c1   :  { %v497_v19 = vmul.f32 2.0, %v496_v18  ;;  %v501_v24 = vmul.f32 %v494_v22, %v402_v0 }
 0x5c3   :  { %v1172_v20 = vadd.f32 -1.0, %v497_v19 }
 0x5c4   :  { %v500_v30 = vpop.permute.xlu1 %499 }
 0x5c5   :  { %v503_v21 = vrot.slane %v1172_v20, 6 }
 0x5c7   :  { %v505_v23 = vmul.f32 %v1439_v16, %v503_v21 }
 0x5c9   :  { %v507_v25 = vrot.slane %v505_v23, 2 }
 0x5cb   :  { %v509_v27 = vadd.f32 %v507_v25, %v501_v24 }
 0x5cd   :  { %1440 = vtanh.f32 %v509_v27 }
 0x5d7   :  { %v1441_v28 = vpop.eup %1440 }
 0x5d8   :  { %v511_v31 = vmul.f32 %v1441_v28, %v500_v30 }
 0x5da   :  { %512 = vst.msk [vmem:[#allocation2 + $0x2] sm:$0x1] %vm297_vm6, %v511_v31  ;;  %1297 = vmatmul.mubr.msk.f32.vlgmr.msra.gmra.mrb[6].mxu1 %vm202_vm7, %v511_v31 }
 0x5db   :  { %1392 = vmatpush3.bf16.msra.mxu1 %v1571_v9  ;;  %1318 = vmatprep.mubr.msk.f32.mxu1 %vm1502_vm0, %v1503_v6 }
 0x5dc   :  { %1393 = vmatprep.subr.bf16.mxu1 %v1501_v4 }
 0x5df   :  { %1395 = vmatpush3.bf16.msra.mxu1 %v1580_v12 }
 0x5e0   :  { %1402 = vmatprep.subr.bf16.mxu1 %v1501_v4 }
 0x6ad   :  { %v582_v32 = vpop.f32.mrb[6].mxu1 }
 0x6ae   :  { %v587_v33 = vrot.slane %v582_v32, 5  ;;  %v1298_v34 = vpop.f32.mrb[7].mxu1 }
 0x6b0   :  { %v589_v35 = vadd.f32 %v587_v33, %v1611_v26 }
 0x6b2   :  { %v590_v36 = vmul.f32 %v589_v35, %v1613_v29 }
 0x6b4   :  { %v1174_v37 = vmul.f32 -1.442695, %v590_v36 }
 0x6b6   :  { %1442 = vpow2.f32 %v1174_v37 }
 0x6c0   :  { %v1443_v38 = vpop.eup %1442 }
 0x6c1   :  { %v594_v39 = vadd.f32 1.0, %v1443_v38 }
 0x6c3   :  { %1444 = vrcp.f32 %v594_v39 }
 0x6cd   :  { %v1445_v40 = vpop.eup %1444 }
 0x6ce   :  { %v598_v41 = vrot.slane %v1445_v40, 3 }
 0x6d0   :  { %600 = vrot.lane.b32.xlu1 %v598_v41, %s1505_s17  ;;  %602 = vrot.lane.b32.xlu0 %v598_v41, %s1506_s4 }
 0x6d4   :  { %606 = vrot.lane.b32.xlu0 %v598_v41, %s1507_s18 }
 0x742   :  { %v603_v42 = vpop.permute.xlu0 %602  ;;  %v601_v46 = vpop.permute.xlu1 %600 }
 0x743   :  { %v604_v43 = vmul.f32 2.0, %v603_v42  ;;  %v608_v48 = vmul.f32 %v601_v46, %v509_v27 }
 0x745   :  { %v1175_v44 = vadd.f32 -1.0, %v604_v43 }
 0x746   :  { %v607_v52 = vpop.permute.xlu0 %606 }
 0x747   :  { %v610_v45 = vrot.slane %v1175_v44, 5 }
 0x749   :  { %v612_v47 = vmul.f32 %v1445_v40, %v610_v45 }
 0x74b   :  { %v614_v49 = vrot.slane %v612_v47, 3 }
 0x74d   :  { %v616_v50 = vadd.f32 %v614_v49, %v608_v48 }
 0x74f   :  { %1446 = vtanh.f32 %v616_v50 }
 0x759   :  { %v1447_v51 = vpop.eup %1446 }
 0x75a   :  { %v618_v53 = vmul.f32 %v1447_v51, %v607_v52 }
 0x75c   :  { %619 = vst.msk [vmem:[#allocation2 + $0x3] sm:$0x1] %vm297_vm6, %v618_v53  ;;  %1308 = vmatmul.mubr.msk.f32.vlgmr.msra.gmra.mrb[4].mxu0 %vm202_vm7, %v618_v53 }
 0x75d   :  { %1398 = vmatpush3.bf16.msra.mxu0 %v1571_v9  ;;  %1329 = vmatprep.mubr.msk.f32.mxu0 %vm1502_vm0, %v1503_v6 }
 0x75e   :  { %1399 = vmatprep.subr.bf16.mxu0 %v1501_v4 }
 0x761   :  { %1401 = vmatpush3.bf16.msra.mxu0 %v1580_v12 }
 0x762   :  { %1408 = vmatprep.subr.bf16.mxu0 %v1501_v4 }
 0x82f   :  { %v689_v54 = vpop.f32.mrb[4].mxu0 }
 0x830   :  { %v694_v55 = vrot.slane %v689_v54, 4  ;;  %v1309_v56 = vpop.f32.mrb[5].mxu0 }
 0x832   :  { %v696_v57 = vadd.f32 %v694_v55, %v1611_v26 }
 0x834   :  { %v697_v58 = vmul.f32 %v696_v57, %v1613_v29 }
 0x836   :  { %v1177_v59 = vmul.f32 -1.442695, %v697_v58 }
 0x838   :  { %1448 = vpow2.f32 %v1177_v59 }
 0x842   :  { %v1449_v60 = vpop.eup %1448 }
 0x843   :  { %v701_v61 = vadd.f32 1.0, %v1449_v60 }
 0x845   :  { %1450 = vrcp.f32 %v701_v61 }
 0x84f   :  { %v1451_v62 = vpop.eup %1450 }
 0x850   :  { %v705_v63 = vrot.slane %v1451_v62, 4 }
 0x852   :  { %707 = vrot.lane.b32.xlu0 %v705_v63, %s1505_s17  ;;  %709 = vrot.lane.b32.xlu1 %v705_v63, %s1506_s4 }
 0x856   :  { %713 = vrot.lane.b32.xlu1 %v705_v63, %s1507_s18 }
 0x8c4   :  { %v710_v0 = vpop.permute.xlu1 %709  ;;  %v708_v5 = vpop.permute.xlu0 %707 }
 0x8c5   :  { %v711_v1 = vmul.f32 2.0, %v710_v0  ;;  %v715_v8 = vmul.f32 %v708_v5, %v616_v50 }
 0x8c7   :  { %v1178_v2 = vadd.f32 -1.0, %v711_v1 }
 0x8c8   :  { %v714_v14 = vpop.permute.xlu1 %713 }
 0x8c9   :  { %v717_v3 = vrot.slane %v1178_v2, 4 }
 0x8cb   :  { %v719_v7 = vmul.f32 %v1451_v62, %v717_v3 }
 0x8cd   :  { %v721_v10 = vrot.slane %v719_v7, 4  ;;  %v1048_v7 = vld [vmem:[%s1738_s5] sm:$0xff] }
 0x8cf   :  { %v723_v11 = vadd.f32 %v721_v10, %v715_v8  ;;  %v1050_v8 = vld [vmem:[%s1738_s5 + $0x10] sm:$0xff]  ;;  %v1051_v10 = vld [vmem:[%s1738_s5 + $0x18] sm:$0xff] }
 0x8d1   :  { %1452 = vtanh.f32 %v723_v11 }
 0x8db   :  { %v1453_v13 = vpop.eup %1452 }
 0x8dc   :  { %v725_v15 = vmul.f32 %v1453_v13, %v714_v14 }
 0x8de   :  { %726 = vst.msk [vmem:[#allocation2 + $0x4] sm:$0x1] %vm297_vm6, %v725_v15  ;;  %1319 = vmatmul.mubr.msk.f32.vlgmr.msra.gmra.mrb[8].mxu1 %vm202_vm7, %v725_v15 }
 0x8df   :  { %1404 = vmatpush3.bf16.msra.mxu1 %v1571_v9  ;;  %1340 = vmatprep.mubr.msk.f32.mxu1 %vm1502_vm0, %v1503_v6 }
 0x8e0   :  { %1405 = vmatprep.subr.bf16.mxu1 %v1501_v4 }
 0x8e3   :  { %1407 = vmatpush3.bf16.msra.mxu1 %v1580_v12 }
 0x9b1   :  { %v796_v16 = vpop.f32.mrb[8].mxu1 }
 0x9b2   :  { %v801_v17 = vrot.slane %v796_v16, 3  ;;  %v1320_v18 = vpop.f32.mrb[9].mxu1 }
 0x9b4   :  { %v803_v19 = vadd.f32 %v801_v17, %v1611_v26 }
 0x9b6   :  { %v804_v20 = vmul.f32 %v803_v19, %v1613_v29 }
 0x9b8   :  { %v1180_v21 = vmul.f32 -1.442695, %v804_v20 }
 0x9ba   :  { %1454 = vpow2.f32 %v1180_v21 }
 0x9c4   :  { %v1455_v22 = vpop.eup %1454 }
 0x9c5   :  { %v808_v23 = vadd.f32 1.0, %v1455_v22 }
 0x9c7   :  { %1456 = vrcp.f32 %v808_v23 }
 0x9d1   :  { %v1457_v9 = vpop.eup %1456 }
 0x9d2   :  { %v812_v24 = vrot.slane %v1457_v9, 5 }
 0x9d4   :  { %814 = vrot.lane.b32.xlu1 %v812_v24, %s1505_s17  ;;  %816 = vrot.lane.b32.xlu0 %v812_v24, %s1506_s4 }
 0x9d8   :  { %820 = vrot.lane.b32.xlu0 %v812_v24, %s1507_s18 }
 0xa46   :  { %v817_v12 = vpop.permute.xlu0 %816  ;;  %v815_v30 = vpop.permute.xlu1 %814 }
 0xa47   :  { %v818_v25 = vmul.f32 2.0, %v817_v12  ;;  %v822_v32 = vmul.f32 %v815_v30, %v723_v11  ;;  %v1412_v11 = vpack.c.bf16 %v1051_v10, %v1050_v8 }
 0xa49   :  { %v1181_v27 = vadd.f32 -1.0, %v818_v25 }
 0xa4a   :  { %v821_v36 = vpop.permute.xlu0 %820 }
 0xa4b   :  { %v824_v28 = vrot.slane %v1181_v27, 3 }
 0xa4d   :  { %v826_v31 = vmul.f32 %v1457_v9, %v824_v28 }
 0xa4f   :  { %v828_v33 = vrot.slane %v826_v31, 5 }
 0xa51   :  { %v830_v34 = vadd.f32 %v828_v33, %v822_v32 }
 0xa53   :  { %1458 = vtanh.f32 %v830_v34 }
 0xa5d   :  { %v1459_v35 = vpop.eup %1458 }
 0xa5e   :  { %v832_v37 = vmul.f32 %v1459_v35, %v821_v36 }
 0xa60   :  { %833 = vst.msk [vmem:[#allocation2 + $0x5] sm:$0x1] %vm297_vm6, %v832_v37  ;;  %1330 = vmatmul.mubr.msk.f32.vlgmr.msra.gmra.mrb[6].mxu0 %vm202_vm7, %v832_v37 }
 0xa61   :  { %1351 = vmatprep.mubr.msk.f32.mxu0 %vm1502_vm0, %v1503_v6 }
 0xb33   :  { %v903_v38 = vpop.f32.mrb[6].mxu0 }
 0xb34   :  { %v908_v39 = vrot.slane %v903_v38, 2  ;;  %v1331_v40 = vpop.f32.mrb[7].mxu0 }
 0xb36   :  { %v910_v41 = vadd.f32 %v908_v39, %v1611_v26 }
 0xb38   :  { %v911_v42 = vmul.f32 %v910_v41, %v1613_v29 }
 0xb3a   :  { %v1183_v43 = vmul.f32 -1.442695, %v911_v42 }
 0xb3c   :  { %1460 = vpow2.f32 %v1183_v43 }
 0xb46   :  { %v1461_v44 = vpop.eup %1460 }
 0xb47   :  { %v915_v45 = vadd.f32 1.0, %v1461_v44 }
 0xb49   :  { %1462 = vrcp.f32 %v915_v45 }
 0xb53   :  { %v1463_v46 = vpop.eup %1462 }
 0xb54   :  { %v919_v47 = vrot.slane %v1463_v46, 6 }
 0xb56   :  { %921 = vrot.lane.b32.xlu0 %v919_v47, %s1505_s17  ;;  %923 = vrot.lane.b32.xlu1 %v919_v47, %s1506_s4 }
 0xb5a   :  { %927 = vrot.lane.b32.xlu1 %v919_v47, %s1507_s18 }
 0xbc8   :  { %v924_v6 = vpop.permute.xlu1 %923  ;;  %v922_v51 = vpop.permute.xlu0 %921 }
 0xbc9   :  { %v925_v48 = vmul.f32 2.0, %v924_v6  ;;  %v929_v53 = vmul.f32 %v922_v51, %v830_v34 }
 0xbcb   :  { %v1184_v49 = vadd.f32 -1.0, %v925_v48 }
 0xbcc   :  { %v928_v57 = vpop.permute.xlu1 %927 }
 0xbcd   :  { %v931_v50 = vrot.slane %v1184_v49, 2 }
 0xbcf   :  { %v933_v52 = vmul.f32 %v1463_v46, %v931_v50 }
 0xbd1   :  { %v935_v54 = vrot.slane %v933_v52, 6 }
 0xbd3   :  { %v937_v55 = vadd.f32 %v935_v54, %v929_v53 }
 0xbd5   :  { %1464 = vtanh.f32 %v937_v55 }
 0xbdf   :  { %v1465_v56 = vpop.eup %1464 }
 0xbe0   :  { %v939_v58 = vmul.f32 %v1465_v56, %v928_v57 }
 0xbe2   :  { %940 = vst.msk [vmem:[#allocation2 + $0x6] sm:$0x1] %vm297_vm6, %v939_v58  ;;  %1341 = vmatmul.mubr.msk.f32.vlgmr.msra.gmra.mrb[10].mxu1 %vm202_vm7, %v939_v58 }
 0xcb5   :  { %v1010_v59 = vpop.f32.mrb[10].mxu1 }
 0xcb6   :  { %v1015_v60 = vrot.slane %v1010_v59, 1  ;;  %v1342_v61 = vpop.f32.mrb[11].mxu1 }
 0xcb8   :  { %v1017_v62 = vadd.f32 %v1015_v60, %v1611_v26  ;;  %v1049_v26 = vld [vmem:[%s1738_s5 + $0x8] sm:$0xff] }
 0xcba   :  { %v1018_v63 = vmul.f32 %v1017_v62, %v1613_v29  ;;  %v1409_v29 = vpack.c.bf16 %v1049_v26, %v1048_v7 }
 0xcbc   :  { %v1186_v0 = vmul.f32 -1.442695, %v1018_v63  ;;  %1410 = vmatpush3.bf16.msra.mxu0 %v1409_v29 }
 0xcbd   :  { %1411 = vmatprep.subr.bf16.mxu0 %v1501_v4  ;;  %v1188_v4 = vld [vmem:[%s1739_s6] ss:$0 sm:$0xff]  ;;  %s1153_s6 = sshll.u32 %s1508_s28, 4  ;;  %s1154_s6 = int_to_ptr.vmem [resolvable:$true] %s1153_s6 }
 0xcbe   :  { %1466 = vpow2.f32 %v1186_v0  ;;  %s1476_s29 = scalar_lea.vmem %s1154_s6, 128  ;;  %p1481_p1 = scmp.lt.s32.totalorder %s1154_s6, %s1154_s6 }
 0xcbf   :  { %p1477_p0 = scmp.ne.s32.totalorder %s1154_s6, %s1476_s29  ;;  %p1482_p2 = scmp.lt.s32.totalorder %s1476_s29, %s1476_s29 }
 0xcc0   :  { %1413 = vmatpush3.bf16.msra.mxu0 %v1412_v11 }
 0xcc1   :  { %p1483_p3 = por %p1482_p2, %p1481_p1 }
 0xcc3   :  { %p1484_p4 = pnand %p1483_p3, %p1477_p0 }
 0xcc8   :  { %v1467_v1 = vpop.eup %1466 }
 0xcc9   :  { %v1022_v2 = vadd.f32 1.0, %v1467_v1 }
 0xccb   :  { %1468 = vrcp.f32 %v1022_v2 }
 0xcd5   :  { %v1469_v3 = vpop.eup %1468 }
 0xcd6   :  { %v1026_v5 = vrot.slane %v1469_v3, 7 }
 0xcd8   :  { %1028 = vrot.lane.b32.xlu1 %v1026_v5, %s1505_s17  ;;  %1030 = vrot.lane.b32.xlu0 %v1026_v5, %s1506_s4 }
 0xcdc   :  { %1034 = vrot.lane.b32.xlu0 %v1026_v5, %s1507_s18 }
 0xd4a   :  { %v1031_v13 = vpop.permute.xlu0 %1030  ;;  %v1029_v17 = vpop.permute.xlu1 %1028 }
 0xd4b   :  { %v1032_v14 = vmul.f32 2.0, %v1031_v13  ;;  %v1036_v19 = vmul.f32 %v1029_v17, %v937_v55 }
 0xd4d   :  { %v1187_v15 = vadd.f32 -1.0, %v1032_v14 }
 0xd4e   :  { %v1035_v23 = vpop.permute.xlu0 %1034 }
 0xd4f   :  { %v1038_v16 = vrot.slane %v1187_v15, 1 }
 0xd51   :  { %v1040_v18 = vmul.f32 %v1469_v3, %v1038_v16 }
 0xd53   :  { %v1042_v20 = vrot.slane %v1040_v18, 7 }
 0xd55   :  { %v1044_v21 = vadd.f32 %v1042_v20, %v1036_v19 }
 0xd57   :  { %1470 = vtanh.f32 %v1044_v21 }
 0xd61   :  { %v1471_v22 = vpop.eup %1470 }
 0xd62   :  { %v1046_v9 = vmul.f32 %v1471_v22, %v1035_v23 }
 0xd64   :  { %1047 = vst.msk [vmem:[#allocation2 + $0x7] sm:$0x1] %vm297_vm6, %v1046_v9 }
 0xd6b   :  { %v1053_v24 = vld [vmem:[#allocation2] sm:$0xff] }
 0xd6c   :  { %1352 = vmatmul.mubr.msk.f32.vlgmr.msra.gmra.mrb[8].mxu0 %vm202_vm7, %v1053_v24 }
 0xe3f   :  { %v1129_v12 = vpop.f32.mrb[8].mxu0 }
 0xe40   :  { %v1130_v25 = vadd.f32 %v1188_v4, %v1129_v12  ;;  %v1353_v27 = vpop.f32.mrb[9].mxu0 }
 0xe42   :  { %v1134_v28 = vsel %vm1133_vm8, %v1130_v25, -inf }
 0xe43   :  { %1135 = vmax.xlane.f32.xlu1 %v1134_v28 }
 0xed0   :  { %v1136_v30 = vpop.xlane.xlu1 %1135 }
 0xed1   :  { %v1137_v31 = vsub.f32 %v1130_v25, %v1136_v30 }
 0xed3   :  { %v1138_v32 = vmul.f32 1.442695, %v1137_v31 }
 0xed5   :  { %1472 = vpow2.f32 %v1138_v32 }
 0xedf   :  { %v1473_v33 = vpop.eup %1472 }
 0xee0   :  { %v1140_v34 = vsel %vm1133_vm8, %v1473_v33, 0.0 }
 0xee1   :  { %1141 = vadd.xlane.f32.xlu0 %v1140_v34 }
 0xf6e   :  { %v1142_v35 = vpop.xlane.xlu0 %1141 }
 0xf6f   :  { %1474 = vlog2.f32 %v1142_v35 }
 0xf79   :  { %v1475_v36 = vpop.eup %1474 }
 0xf7a   :  { %v1144_v37 = vmul.f32 0.6931472, %v1475_v36 }
 0xf7c   :  { %v1145_v38 = vsub.f32 %v1137_v31, %v1144_v37 }
 0xf7e   :  { %1146 = vst.msk [vmem:[#allocation3] sm:$0xff] %vm1133_vm8, %v1145_v38 }
 0xf7f   :  { %1487 = shalt.err (!%p1484_p4)
}
 0xf80   :  { %s1488_s1 = scalar_lea.hbm %s1740_s7, 128 }
 0xf81   :  { %p1489_p5 = scmp.ne.s32.totalorder %s1740_s7, %s1488_s1  ;;  %p1492_p6 = scmp.lt.u32.totalorder %s1488_s1, %s1740_s7 }
 0xf83   :  { %p1494_p7 = pnand %p1492_p6, %p1489_p5 }
 0xf85   :  { %1497 = shalt.err (!%p1494_p7)
}
 0xf86   :  { %1156 = dma.vmem_to_hbm [thread:$0]  %s1154_s6, 128, %s1740_s7, [#allocation4]  }
 0xf87   :  { %1498 = dma.done.wait [#allocation4], 128  }
 0xf88   :  { %1499 = vsyncadd [#allocation4], 4294967168 }
 0xf89   :  { %1160 = vsyncpa [#allocation4], 1 }

</bundles_post_ra>
